<compile_context>
chip_gen: v5e
topology: v5e:2x2
jax: 0.10.0
libtpu: 0.0.40
codegen_flags: <defaults>
</compile_context>

<pallas_src>
import functools

import jax
import jax.numpy as jnp
from jax.experimental import pallas as pl
from jax.experimental.pallas import tpu as pltpu


def _round_up(v, m):
    return ((v + m - 1) // m) * m


def _transition_kernel(x_ref, w1_ref, w2_ref, bin_ref, wh_ref, bh_ref,
                       wlog_ref, blog_ref, wsc_ref, bsc_ref,
                       ssum_ref, rt_ref, c_ref, mean_ref, out_ref, *, eps):
    f32 = jnp.float32
    x = x_ref[...]                                             # [TB2, 2*O]

    # x_relative = x / clamp_min(sum(x), eps), per packed half (Ssum broadcasts
    # each half's row sum across that half's O lanes).
    sums = jnp.dot(x, ssum_ref[...], preferred_element_type=f32)
    x_rel = x * pl.reciprocal(jnp.maximum(sums, eps), approx=True)

    # fc_in without the concat: x @ W1 + x_rel @ W2 + b  (block-diag weights).
    state = (jnp.dot(x, w1_ref[...], preferred_element_type=f32)
             + jnp.dot(x_rel, w2_ref[...], preferred_element_type=f32)
             + bin_ref[...])
    state = jnp.maximum(state, 0.0)
    state = jnp.dot(state, wh_ref[...], preferred_element_type=f32) + bh_ref[...]
    state = jnp.maximum(state, 0.0)                            # [TB2, 2*width]

    # Logit head (diag +bias folded into blog) and lane-aligned scale head
    # (already replicated O times per half and multiplied by out_features).
    logits = (jnp.dot(state, wlog_ref[...], preferred_element_type=f32)
              + blog_ref[...])                                 # [TB2, 2*K]
    scale = (jnp.dot(state, wsc_ref[...], preferred_element_type=f32)
             + bsc_ref[...])                                   # [TB2, 2*O]

    # Segmented softmax over each length-O segment; a single row-global max is
    # valid because softmax is shift-invariant within every segment.
    m = jnp.max(logits, axis=-1, keepdims=True)
    e = jnp.exp(logits - m)                                    # [TB2, 2*K]

    denom = jnp.dot(e, rt_ref[...], preferred_element_type=f32)       # [TB2, 2*O]
    inv = pl.reciprocal(denom, approx=True)
    x_tiled = jnp.dot(x, c_ref[...], preferred_element_type=f32)      # [TB2, 2*K]
    num = jnp.dot(e * x_tiled, rt_ref[...], preferred_element_type=f32)

    # (softmax - I) @ x fused algebraically: softmax @ x - x.
    deltas = inv * num - x
    scaled = deltas * scale
    # per-half mean removal via a tiny block matmul (MXU slack)
    out_ref[...] = scaled - jnp.dot(scaled, mean_ref[...],
                                    preferred_element_type=f32)


def transition_matrix_forward(x, params, *, out_features, bias=5.0, eps=1e-8,
                              block_rows=1024):
    """Pallas forward pass for TransitionMatrix (float32)."""
    B, F = x.shape
    O = out_features
    K = O * O
    width = params["b_in"].shape[0]
    assert F == O, "module semantics require in_features == out_features"

    # Two batch rows packed per lane-row -> choose a packed-row tile TB2.
    rows_needed = _round_up(max(pl.cdiv(B, 2), 1), 8)
    TB2 = _round_up(min(int(block_rows), rows_needed), 8)
    if rows_needed <= TB2 and rows_needed > 8:
        # Guarantee >= 2 grid steps so the "parallel" batch axis can shard
        # across v7x's two TensorCores (neutral on v5e/v6e).
        TB2 = _round_up(pl.cdiv(rows_needed, 2), 8)
    B_half = _round_up(rows_needed, TB2)
    B_pad = 2 * B_half

    x32 = x.astype(jnp.float32)
    if B_pad != B:
        # Padded rows produce finite (discarded) outputs; they never feed NaN
        # into the real half sharing their packed row.
        x32 = jnp.pad(x32, ((0, B_pad - B), (0, 0)))
    # pack: packed row r holds batch row r (lanes 0:O) and r+B_half (lanes O:2O)
    x_packed = jnp.concatenate([x32[:B_half], x32[B_half:]], axis=1)

    def blkdiag2(a):
        p, q = a.shape
        z = jnp.zeros((p, q), jnp.float32)
        top = jnp.concatenate([a, z], axis=1)
        bot = jnp.concatenate([z, a], axis=1)
        return jnp.concatenate([top, bot], axis=0)

    # PyTorch Linear weights are [out, in]; build transposed, block-diagonal
    # (two packed halves) versions for row-major `x @ W`.
    W_in = params["W_in"].astype(jnp.float32)                # [width, 2F]
    W1_blk = blkdiag2(W_in[:, :F].T)                          # [2F, 2w]  x path
    W2_blk = blkdiag2(W_in[:, F:].T)                          # [2F, 2w]  x_rel path
    Wh_blk = blkdiag2(params["W_h"].astype(jnp.float32).T)    # [2w, 2w]
    W_out = params["W_out"].astype(jnp.float32)               # [K+1, width]
    Wlog_blk = blkdiag2(W_out[:K].T)                          # [2w, 2K]
    # scale column replicated O times per half, `* out_features` folded in
    Wsc_blk = blkdiag2(jnp.tile(W_out[K][:, None] * float(O), (1, O)))  # [2w, 2O]

    b_in_blk = jnp.tile(params["b_in"].astype(jnp.float32), 2)[None, :]
    b_h_blk = jnp.tile(params["b_h"].astype(jnp.float32), 2)[None, :]
    b_out = params["b_out"].astype(jnp.float32)
    k = jnp.arange(K)
    diag = (k % (O + 1) == 0).astype(jnp.float32)             # flattened identity
    b_log_blk = jnp.tile(b_out[:K] + float(bias) * diag, 2)[None, :]
    b_sc_blk = jnp.full((1, 2 * O), b_out[K] * float(O), jnp.float32)

    # Selector constants (block-diagonal over the two packed halves):
    #   Ssum  [2O,2O]: per-half row-sum broadcast to the half's O lanes
    #   RT    [2K,2O]: per-segment (length-O) lane reduction
    #   C     [2O,2K]: tile x across the O segments
    #   Mmean [2O,2O]: per-half mean
    o = jnp.arange(O)
    RT_blk = blkdiag2((k[:, None] // O == o[None, :]).astype(jnp.float32))
    C_blk = blkdiag2((k[None, :] % O == o[:, None]).astype(jnp.float32))
    Ssum_blk = blkdiag2(jnp.ones((O, O), jnp.float32))
    Mmean_blk = Ssum_blk / float(O)

    consts = (W1_blk, W2_blk, b_in_blk, Wh_blk, b_h_blk, Wlog_blk, b_log_blk,
              Wsc_blk, b_sc_blk, Ssum_blk, RT_blk, C_blk, Mmean_blk)

    in_specs = ([pl.BlockSpec((TB2, 2 * F), lambda i: (i, 0))]
                + [pl.BlockSpec(a.shape, lambda i: (0, 0)) for a in consts])

    kernel = functools.partial(_transition_kernel, eps=float(eps))

    out_packed = pl.pallas_call(
        kernel,
        out_shape=jax.ShapeDtypeStruct((B_half, 2 * O), jnp.float32),
        grid=(B_half // TB2,),
        in_specs=in_specs,
        out_specs=pl.BlockSpec((TB2, 2 * O), lambda i: (i, 0)),
        compiler_params=pltpu.CompilerParams(
            dimension_semantics=("parallel",),
            vmem_limit_bytes=32 * 1024 * 1024),
    )(x_packed, *consts)

    # unpack: rows 0..B_half-1 from lanes 0:O, rows B_half.. from lanes O:2O
    out_full = jnp.concatenate([out_packed[:, :O], out_packed[:, O:]], axis=0)
    return out_full[:B]


def reference_forward(x, params, *, out_features, bias=5.0, eps=1e-8):
    """Pure-JAX float32 mirror of the PyTorch forward (for validation)."""
    O = out_features
    x = x.astype(jnp.float32)
    s = jnp.maximum(x.sum(-1, keepdims=True), eps)
    xin = jnp.concatenate([x, x / s], axis=-1)
    st = xin @ params["W_in"].T + params["b_in"]
    st = jax.nn.relu(st)
    st = st @ params["W_h"].T + params["b_h"]
    st = jax.nn.relu(st)
    out = st @ params["W_out"].T + params["b_out"]
    logits_raw, scale = out[:, :-1], out[:, -1]
    logits = logits_raw.reshape(-1, O, O) + bias * jnp.eye(O)[None]
    tm = jax.nn.softmax(logits, axis=-1)
    tm_nd = tm - jnp.eye(O)[None]
    deltas = jnp.einsum("bij,bj->bi", tm_nd, x)
    scaled = deltas * (scale[:, None] * O)
    return scaled - scaled.mean(-1, keepdims=True)


def init_params(key, in_features, out_features, width):
    """Deterministic PyTorch-Linear-style init (uniform +/- 1/sqrt(fan_in))."""
    O = out_features
    ks = jax.random.split(key, 6)

    def lin(kw, kb, fan_in, fan_out):
        lim = 1.0 / jnp.sqrt(fan_in)
        W = jax.random.uniform(kw, (fan_out, fan_in), jnp.float32, -lim, lim)
        b = jax.random.uniform(kb, (fan_out,), jnp.float32, -lim, lim)
        return W, b

    W_in, b_in = lin(ks[0], ks[1], 2 * in_features, width)
    W_h, b_h = lin(ks[2], ks[3], width, width)
    W_out, b_out = lin(ks[4], ks[5], width, O * O + 1)
    return {"W_in": W_in, "b_in": b_in, "W_h": W_h, "b_h": b_h,
            "W_out": W_out, "b_out": b_out}


if __name__ == "__main__":
    in_features = 8
    out_features = 8          # matmul with x requires in_features == out_features
    width = 32
    batch = 8
    bias = 5.0

    key = jax.random.PRNGKey(0)
    kx, kp = jax.random.split(key)
    x = jax.random.uniform(kx, (batch, in_features), jnp.float32, 0.1, 1.0)
    params = init_params(kp, in_features, out_features, width)

    out = transition_matrix_forward(x, params, out_features=out_features,
                                    bias=bias)
    out = jax.block_until_ready(out)
    ref = reference_forward(x, params, out_features=out_features, bias=bias)
    assert out.shape == (batch, out_features)
    assert jnp.allclose(out, ref, rtol=1e-3, atol=1e-3), (
        f"max abs err {jnp.max(jnp.abs(out - ref))}")

    # Second check: multi-tile pipelining + batch padding with lane packing
    # (B=200 -> 104 packed rows -> padded to 128, tile 32, grid=(4,)).
    x2 = jax.random.uniform(jax.random.PRNGKey(1), (200, in_features),
                            jnp.float32, 0.1, 1.0)
    out2 = transition_matrix_forward(x2, params, out_features=out_features,
                                     bias=bias, block_rows=32)
    out2 = jax.block_until_ready(out2)
    ref2 = reference_forward(x2, params, out_features=out_features, bias=bias)
    assert out2.shape == (200, out_features)
    assert jnp.allclose(out2, ref2, rtol=1e-3, atol=1e-3), (
        f"max abs err {jnp.max(jnp.abs(out2 - ref2))}")

    print("KERNEL_OK")
</pallas_src>

<mosaic_0001>
module attributes {stable_mosaic.version = 11 : i64} {
  func.func @_transition_kernel(%arg0: i32, %arg1: memref<8x16xf32, #tpu.memory_space<vmem>>, %arg2: memref<16x64xf32, #tpu.memory_space<vmem>>, %arg3: memref<16x64xf32, #tpu.memory_space<vmem>>, %arg4: memref<1x64xf32, #tpu.memory_space<vmem>>, %arg5: memref<64x64xf32, #tpu.memory_space<vmem>>, %arg6: memref<1x64xf32, #tpu.memory_space<vmem>>, %arg7: memref<64x128xf32, #tpu.memory_space<vmem>>, %arg8: memref<1x128xf32, #tpu.memory_space<vmem>>, %arg9: memref<64x16xf32, #tpu.memory_space<vmem>>, %arg10: memref<1x16xf32, #tpu.memory_space<vmem>>, %arg11: memref<16x16xf32, #tpu.memory_space<vmem>>, %arg12: memref<128x16xf32, #tpu.memory_space<vmem>>, %arg13: memref<16x128xf32, #tpu.memory_space<vmem>>, %arg14: memref<16x16xf32, #tpu.memory_space<vmem>>, %arg15: memref<8x16xf32, #tpu.memory_space<vmem>>) attributes {dimension_semantics = [#tpu.dimension_semantics<parallel>], iteration_bounds = array<i64: 1>, scalar_prefetch = 0 : i64, scratch_operands = 0 : i64, tpu.core_type = #tpu.core_type<tc>, window_params = [{transform_indices = @transform_0, window_bounds = array<i64: 8, 16>}, {pipeline_mode = #tpu.pipeline_mode<synchronous>, transform_indices = @transform_1, window_bounds = array<i64: 16, 64>}, {pipeline_mode = #tpu.pipeline_mode<synchronous>, transform_indices = @transform_2, window_bounds = array<i64: 16, 64>}, {pipeline_mode = #tpu.pipeline_mode<synchronous>, transform_indices = @transform_3, window_bounds = array<i64: 1, 64>}, {pipeline_mode = #tpu.pipeline_mode<synchronous>, transform_indices = @transform_4, window_bounds = array<i64: 64, 64>}, {pipeline_mode = #tpu.pipeline_mode<synchronous>, transform_indices = @transform_5, window_bounds = array<i64: 1, 64>}, {pipeline_mode = #tpu.pipeline_mode<synchronous>, transform_indices = @transform_6, window_bounds = array<i64: 64, 128>}, {pipeline_mode = #tpu.pipeline_mode<synchronous>, transform_indices = @transform_7, window_bounds = array<i64: 1, 128>}, {pipeline_mode = #tpu.pipeline_mode<synchronous>, transform_indices = @transform_8, window_bounds = array<i64: 64, 16>}, {pipeline_mode = #tpu.pipeline_mode<synchronous>, transform_indices = @transform_9, window_bounds = array<i64: 1, 16>}, {pipeline_mode = #tpu.pipeline_mode<synchronous>, transform_indices = @transform_10, window_bounds = array<i64: 16, 16>}, {pipeline_mode = #tpu.pipeline_mode<synchronous>, transform_indices = @transform_11, window_bounds = array<i64: 128, 16>}, {pipeline_mode = #tpu.pipeline_mode<synchronous>, transform_indices = @transform_12, window_bounds = array<i64: 16, 128>}, {pipeline_mode = #tpu.pipeline_mode<synchronous>, transform_indices = @transform_13, window_bounds = array<i64: 16, 16>}, {transform_indices = @transform_14, window_bounds = array<i64: 8, 16>}]} {
    %c0 = arith.constant 0 : index
    %c0_0 = arith.constant 0 : index
    %0 = vector.load %arg1[%c0, %c0_0] : memref<8x16xf32, #tpu.memory_space<vmem>>, vector<8x16xf32>
    %c0_1 = arith.constant 0 : index
    %c0_2 = arith.constant 0 : index
    %1 = vector.load %arg11[%c0_1, %c0_2] : memref<16x16xf32, #tpu.memory_space<vmem>>, vector<16x16xf32>
    %cst = arith.constant dense<0.000000e+00> : vector<8x16xf32>
    %2 = tpu.matmul %0, %1, %cst {dimension_numbers = #tpu.dot_dimension_numbers<[1], [0], [0], [1], [0, 0, 1, 1], [], []>} : vector<8x16xf32>, vector<16x16xf32>, vector<8x16xf32> -> vector<8x16xf32>
    %cst_3 = arith.constant 9.99999993E-9 : f32
    %3 = vector.broadcast %cst_3 : f32 to vector<8x16xf32>
    %4 = arith.maximumf %2, %3 : vector<8x16xf32>
    %5 = tpu.reciprocal %4 {approx = true} : vector<8x16xf32> -> vector<8x16xf32>
    %6 = arith.mulf %0, %5 : vector<8x16xf32>
    %c0_4 = arith.constant 0 : index
    %c0_5 = arith.constant 0 : index
    %7 = vector.load %arg2[%c0_4, %c0_5] : memref<16x64xf32, #tpu.memory_space<vmem>>, vector<16x64xf32>
    %cst_6 = arith.constant dense<0.000000e+00> : vector<8x64xf32>
    %8 = tpu.matmul %0, %7, %cst_6 {dimension_numbers = #tpu.dot_dimension_numbers<[1], [0], [0], [1], [0, 0, 1, 1], [], []>} : vector<8x16xf32>, vector<16x64xf32>, vector<8x64xf32> -> vector<8x64xf32>
    %c0_7 = arith.constant 0 : index
    %c0_8 = arith.constant 0 : index
    %9 = vector.load %arg3[%c0_7, %c0_8] : memref<16x64xf32, #tpu.memory_space<vmem>>, vector<16x64xf32>
    %cst_9 = arith.constant dense<0.000000e+00> : vector<8x64xf32>
    %10 = tpu.matmul %6, %9, %cst_9 {dimension_numbers = #tpu.dot_dimension_numbers<[1], [0], [0], [1], [0, 0, 1, 1], [], []>} : vector<8x16xf32>, vector<16x64xf32>, vector<8x64xf32> -> vector<8x64xf32>
    %11 = arith.addf %8, %10 : vector<8x64xf32>
    %c0_10 = arith.constant 0 : index
    %c0_11 = arith.constant 0 : index
    %12 = vector.load %arg4[%c0_10, %c0_11] : memref<1x64xf32, #tpu.memory_space<vmem>>, vector<1x64xf32>
    %13 = vector.broadcast %12 : vector<1x64xf32> to vector<8x64xf32>
    %14 = arith.addf %11, %13 : vector<8x64xf32>
    %cst_12 = arith.constant 0.000000e+00 : f32
    %15 = vector.broadcast %cst_12 : f32 to vector<8x64xf32>
    %16 = arith.maximumf %14, %15 : vector<8x64xf32>
    %c0_13 = arith.constant 0 : index
    %c0_14 = arith.constant 0 : index
    %17 = vector.load %arg5[%c0_13, %c0_14] : memref<64x64xf32, #tpu.memory_space<vmem>>, vector<64x64xf32>
    %cst_15 = arith.constant dense<0.000000e+00> : vector<8x64xf32>
    %18 = tpu.matmul %16, %17, %cst_15 {dimension_numbers = #tpu.dot_dimension_numbers<[1], [0], [0], [1], [0, 0, 1, 1], [], []>} : vector<8x64xf32>, vector<64x64xf32>, vector<8x64xf32> -> vector<8x64xf32>
    %c0_16 = arith.constant 0 : index
    %c0_17 = arith.constant 0 : index
    %19 = vector.load %arg6[%c0_16, %c0_17] : memref<1x64xf32, #tpu.memory_space<vmem>>, vector<1x64xf32>
    %20 = vector.broadcast %19 : vector<1x64xf32> to vector<8x64xf32>
    %21 = arith.addf %18, %20 : vector<8x64xf32>
    %cst_18 = arith.constant 0.000000e+00 : f32
    %22 = vector.broadcast %cst_18 : f32 to vector<8x64xf32>
    %23 = arith.maximumf %21, %22 : vector<8x64xf32>
    %c0_19 = arith.constant 0 : index
    %c0_20 = arith.constant 0 : index
    %24 = vector.load %arg7[%c0_19, %c0_20] : memref<64x128xf32, #tpu.memory_space<vmem>>, vector<64x128xf32>
    %cst_21 = arith.constant dense<0.000000e+00> : vector<8x128xf32>
    %25 = tpu.matmul %23, %24, %cst_21 {dimension_numbers = #tpu.dot_dimension_numbers<[1], [0], [0], [1], [0, 0, 1, 1], [], []>} : vector<8x64xf32>, vector<64x128xf32>, vector<8x128xf32> -> vector<8x128xf32>
    %c0_22 = arith.constant 0 : index
    %c0_23 = arith.constant 0 : index
    %26 = vector.load %arg8[%c0_22, %c0_23] : memref<1x128xf32, #tpu.memory_space<vmem>>, vector<1x128xf32>
    %27 = vector.broadcast %26 : vector<1x128xf32> to vector<8x128xf32>
    %28 = arith.addf %25, %27 : vector<8x128xf32>
    %c0_24 = arith.constant 0 : index
    %c0_25 = arith.constant 0 : index
    %29 = vector.load %arg9[%c0_24, %c0_25] : memref<64x16xf32, #tpu.memory_space<vmem>>, vector<64x16xf32>
    %cst_26 = arith.constant dense<0.000000e+00> : vector<8x16xf32>
    %30 = tpu.matmul %23, %29, %cst_26 {dimension_numbers = #tpu.dot_dimension_numbers<[1], [0], [0], [1], [0, 0, 1, 1], [], []>} : vector<8x64xf32>, vector<64x16xf32>, vector<8x16xf32> -> vector<8x16xf32>
    %c0_27 = arith.constant 0 : index
    %c0_28 = arith.constant 0 : index
    %31 = vector.load %arg10[%c0_27, %c0_28] : memref<1x16xf32, #tpu.memory_space<vmem>>, vector<1x16xf32>
    %32 = vector.broadcast %31 : vector<1x16xf32> to vector<8x16xf32>
    %33 = arith.addf %30, %32 : vector<8x16xf32>
    %cst_29 = arith.constant dense<0xFF800000> : vector<8xf32>
    %34 = vector.multi_reduction <maximumf>, %28, %cst_29 [1] : vector<8x128xf32> to vector<8xf32>
    %35 = vector.shape_cast %34 : vector<8xf32> to vector<8x1xf32>
    %36 = vector.broadcast %35 : vector<8x1xf32> to vector<8x128xf32>
    %37 = arith.subf %28, %36 : vector<8x128xf32>
    %38 = math.exp %37 : vector<8x128xf32>
    %c0_30 = arith.constant 0 : index
    %c0_31 = arith.constant 0 : index
    %39 = vector.load %arg12[%c0_30, %c0_31] : memref<128x16xf32, #tpu.memory_space<vmem>>, vector<128x16xf32>
    %cst_32 = arith.constant dense<0.000000e+00> : vector<8x16xf32>
    %40 = tpu.matmul %38, %39, %cst_32 {dimension_numbers = #tpu.dot_dimension_numbers<[1], [0], [0], [1], [0, 0, 1, 1], [], []>} : vector<8x128xf32>, vector<128x16xf32>, vector<8x16xf32> -> vector<8x16xf32>
    %41 = tpu.reciprocal %40 {approx = true} : vector<8x16xf32> -> vector<8x16xf32>
    %c0_33 = arith.constant 0 : index
    %c0_34 = arith.constant 0 : index
    %42 = vector.load %arg13[%c0_33, %c0_34] : memref<16x128xf32, #tpu.memory_space<vmem>>, vector<16x128xf32>
    %cst_35 = arith.constant dense<0.000000e+00> : vector<8x128xf32>
    %43 = tpu.matmul %0, %42, %cst_35 {dimension_numbers = #tpu.dot_dimension_numbers<[1], [0], [0], [1], [0, 0, 1, 1], [], []>} : vector<8x16xf32>, vector<16x128xf32>, vector<8x128xf32> -> vector<8x128xf32>
    %44 = arith.mulf %38, %43 : vector<8x128xf32>
    %c0_36 = arith.constant 0 : index
    %c0_37 = arith.constant 0 : index
    %45 = vector.load %arg12[%c0_36, %c0_37] : memref<128x16xf32, #tpu.memory_space<vmem>>, vector<128x16xf32>
    %cst_38 = arith.constant dense<0.000000e+00> : vector<8x16xf32>
    %46 = tpu.matmul %44, %45, %cst_38 {dimension_numbers = #tpu.dot_dimension_numbers<[1], [0], [0], [1], [0, 0, 1, 1], [], []>} : vector<8x128xf32>, vector<128x16xf32>, vector<8x16xf32> -> vector<8x16xf32>
    %47 = arith.mulf %41, %46 : vector<8x16xf32>
    %48 = arith.subf %47, %0 : vector<8x16xf32>
    %49 = arith.mulf %48, %33 : vector<8x16xf32>
    %c0_39 = arith.constant 0 : index
    %c0_40 = arith.constant 0 : index
    %50 = vector.load %arg14[%c0_39, %c0_40] : memref<16x16xf32, #tpu.memory_space<vmem>>, vector<16x16xf32>
    %cst_41 = arith.constant dense<0.000000e+00> : vector<8x16xf32>
    %51 = tpu.matmul %49, %50, %cst_41 {dimension_numbers = #tpu.dot_dimension_numbers<[1], [0], [0], [1], [0, 0, 1, 1], [], []>} : vector<8x16xf32>, vector<16x16xf32>, vector<8x16xf32> -> vector<8x16xf32>
    %52 = arith.subf %49, %51 : vector<8x16xf32>
    %c0_42 = arith.constant 0 : index
    %c0_43 = arith.constant 0 : index
    %53 = vector.load %arg15[%c0_42, %c0_43] : memref<8x16xf32, #tpu.memory_space<vmem>>, vector<8x16xf32>
    tpu.vector_store %arg15[%c0_42, %c0_43], %52 {strides = array<i32>} : memref<8x16xf32, #tpu.memory_space<vmem>>, vector<8x16xf32>,
    return
  }
  func.func @transform_0(%arg0: i32) -> (i32, i32) {
    %c0_i32 = arith.constant 0 : i32
    %c0_i32_0 = arith.constant 0 : i32
    return %arg0, %c0_i32 : i32, i32
  }
  func.func @transform_1(%arg0: i32) -> (i32, i32) {
    %c0_i32 = arith.constant 0 : i32
    %c0_i32_0 = arith.constant 0 : i32
    %c0_i32_1 = arith.constant 0 : i32
    return %c0_i32, %c0_i32_0 : i32, i32
  }
  func.func @transform_2(%arg0: i32) -> (i32, i32) {
    %c0_i32 = arith.constant 0 : i32
    %c0_i32_0 = arith.constant 0 : i32
    %c0_i32_1 = arith.constant 0 : i32
    return %c0_i32, %c0_i32_0 : i32, i32
  }
  func.func @transform_3(%arg0: i32) -> (i32, i32) {
    %c0_i32 = arith.constant 0 : i32
    %c0_i32_0 = arith.constant 0 : i32
    %c0_i32_1 = arith.constant 0 : i32
    return %c0_i32, %c0_i32_0 : i32, i32
  }
  func.func @transform_4(%arg0: i32) -> (i32, i32) {
    %c0_i32 = arith.constant 0 : i32
    %c0_i32_0 = arith.constant 0 : i32
    %c0_i32_1 = arith.constant 0 : i32
    return %c0_i32, %c0_i32_0 : i32, i32
  }
  func.func @transform_5(%arg0: i32) -> (i32, i32) {
    %c0_i32 = arith.constant 0 : i32
    %c0_i32_0 = arith.constant 0 : i32
    %c0_i32_1 = arith.constant 0 : i32
    return %c0_i32, %c0_i32_0 : i32, i32
  }
  func.func @transform_6(%arg0: i32) -> (i32, i32) {
    %c0_i32 = arith.constant 0 : i32
    %c0_i32_0 = arith.constant 0 : i32
    %c0_i32_1 = arith.constant 0 : i32
    return %c0_i32, %c0_i32_0 : i32, i32
  }
  func.func @transform_7(%arg0: i32) -> (i32, i32) {
    %c0_i32 = arith.constant 0 : i32
    %c0_i32_0 = arith.constant 0 : i32
    %c0_i32_1 = arith.constant 0 : i32
    return %c0_i32, %c0_i32_0 : i32, i32
  }
  func.func @transform_8(%arg0: i32) -> (i32, i32) {
    %c0_i32 = arith.constant 0 : i32
    %c0_i32_0 = arith.constant 0 : i32
    %c0_i32_1 = arith.constant 0 : i32
    return %c0_i32, %c0_i32_0 : i32, i32
  }
  func.func @transform_9(%arg0: i32) -> (i32, i32) {
    %c0_i32 = arith.constant 0 : i32
    %c0_i32_0 = arith.constant 0 : i32
    %c0_i32_1 = arith.constant 0 : i32
    return %c0_i32, %c0_i32_0 : i32, i32
  }
  func.func @transform_10(%arg0: i32) -> (i32, i32) {
    %c0_i32 = arith.constant 0 : i32
    %c0_i32_0 = arith.constant 0 : i32
    %c0_i32_1 = arith.constant 0 : i32
    return %c0_i32, %c0_i32_0 : i32, i32
  }
  func.func @transform_11(%arg0: i32) -> (i32, i32) {
    %c0_i32 = arith.constant 0 : i32
    %c0_i32_0 = arith.constant 0 : i32
    %c0_i32_1 = arith.constant 0 : i32
    return %c0_i32, %c0_i32_0 : i32, i32
  }
  func.func @transform_12(%arg0: i32) -> (i32, i32) {
    %c0_i32 = arith.constant 0 : i32
    %c0_i32_0 = arith.constant 0 : i32
    %c0_i32_1 = arith.constant 0 : i32
    return %c0_i32, %c0_i32_0 : i32, i32
  }
  func.func @transform_13(%arg0: i32) -> (i32, i32) {
    %c0_i32 = arith.constant 0 : i32
    %c0_i32_0 = arith.constant 0 : i32
    %c0_i32_1 = arith.constant 0 : i32
    return %c0_i32, %c0_i32_0 : i32, i32
  }
  func.func @transform_14(%arg0: i32) -> (i32, i32) {
    %c0_i32 = arith.constant 0 : i32
    %c0_i32_0 = arith.constant 0 : i32
    return %arg0, %c0_i32 : i32, i32
  }
}

</mosaic_0001>

<bundles_post_ra>
// kernel: tpu_custom_call.1
= control target key start
LH: loop header
LB: loop body
LE: loop exit
PB: predicated region body
PF: predicated region fallthrough
CT: control target
= control target key end

     0   :  { %19 = vsyncpa [#allocation3], 0  ;;  %s714_s0 = inlined_call_operand.hbm [shape: f32[8,16], index: 0, kind: input, shape index: {}]   ;;  %s715_s1 = inlined_call_operand.vmem [shape: f32[16,64], index: 1, kind: input, shape index: {}]   ;;  %s716_s2 = inlined_call_operand.vmem [shape: f32[16,64], index: 2, kind: input, shape index: {}]   ;;  %s717_s3 = inlined_call_operand.vmem [shape: f32[1,64], index: 3, kind: input, shape index: {}]   ;;  %s718_s4 = inlined_call_operand.vmem [shape: f32[64,64], index: 4, kind: input, shape index: {}]   ;;  %s719_s5 = inlined_call_operand.vmem [shape: f32[1,64], index: 5, kind: input, shape index: {}]   ;;  %s720_s6 = inlined_call_operand.vmem [shape: f32[64,128], index: 6, kind: input, shape index: {}]   ;;  %s721_s7 = inlined_call_operand.vmem [shape: f32[1,128], index: 7, kind: input, shape index: {}]   ;;  %s722_s8 = inlined_call_operand.vmem [shape: f32[64,16], index: 8, kind: input, shape index: {}]   ;;  %s723_s9 = inlined_call_operand.vmem [shape: f32[1,16], index: 9, kind: input, shape index: {}]   ;;  %s724_s10 = inlined_call_operand.vmem [shape: f32[16,16], index: 10, kind: input, shape index: {}]   ;;  %s725_s11 = inlined_call_operand.vmem [shape: f32[128,16], index: 11, kind: input, shape index: {}]   ;;  %s726_s12 = inlined_call_operand.vmem [shape: f32[16,128], index: 12, kind: input, shape index: {}]   ;;  %s727_s13 = inlined_call_operand.vmem [shape: f32[16,16], index: 13, kind: input, shape index: {}]   ;;  %s728_s14 = inlined_call_operand.hbm [shape: f32[8,16], index: 14, kind: output, shape index: {}]  }
   0x1   :  { %20 = vsyncpa [#allocation4], 0  ;;  %s26_s15 = sshll.u32 %s714_s0, 4  ;;  %s453_s16 = smov [#allocation2]   ;;  %s27_s15 = int_to_ptr.hbm [resolvable:$true] %s26_s15 }
   0x2   :  { %s28_s17 = sshll.u32 %s453_s16, 4  ;;  %s29_s17 = int_to_ptr.vmem [resolvable:$true] %s28_s17 }
   0x3   :  { %31 = dma.hbm_to_vmem [thread:$0]  %s27_s15, 128, %s29_s17, [#allocation3]  }
   0x4   :  { %449 = dma.done.wait [#allocation3], 128  }
   0x5   :  { %450 = vsyncadd [#allocation3], 4294967168  ;;  %v64_v0 = vld [vmem:[%s724_s10 + $0x8] sm:$0xff]  ;;  %v63_v1 = vld [vmem:[%s724_s10] sm:$0xff]  ;;  %vm65_vm0 = vcmask 130048   ;;  %vm157_vm1 = vcmask 523264  }
   0x6   :  { %v539_v2 = vld [vmem:[#allocation2] sm:$0xff]  ;;  %83 = vmatpush.msra.mxu0 %v64_v0  ;;  %v93_v3 = vld [vmem:[%s715_s1 + $0x8] sm:$0xff]  ;;  %v152_v7 = vld [vmem:[%s718_s4 + $0x38] sm:$0xff]  ;;  %s454_s29 = smov [#allocation5]  }
   0x7   :  { %133 = vmatpush.msra.mxu2 %v93_v3  ;;  %v92_v4 = vld [vmem:[%s715_s1] sm:$0xff]  ;;  %v95_v5 = vld [vmem:[%s716_s2 + $0x8] sm:$0xff]  ;;  %v151_v8 = vld [vmem:[%s718_s4 + $0x30] sm:$0xff]  ;;  %169 = vmatpush.msra.mxu3 %v152_v7  ;;  %s369_s30 = sshll.u32 %s454_s29, 4  ;;  %s371_s1 = sshll.u32 %s728_s14, 4  ;;  %s370_s30 = int_to_ptr.vmem [resolvable:$true] %s369_s30  ;;  %s372_s1 = int_to_ptr.hbm [resolvable:$true] %s371_s1 }
   0x8   :  { %84 = vmatpush.msra.mxu0 %v63_v1  ;;  %v94_v6 = vld [vmem:[%s716_s2] sm:$0xff]  ;;  %113 = vmatpush.msra.mxu1 %v95_v5  ;;  %v150_v9 = vld [vmem:[%s718_s4 + $0x28] sm:$0xff]  ;;  %v148_v15 = vld [vmem:[%s718_s4 + $0x18] sm:$0xff] }
   0x9   :  { %381 = vmatmul.msk.f32.vlgmr.msra.gmra.mxu0 %vm65_vm0, %v539_v2  ;;  %134 = vmatpush.msra.mxu2 %v92_v4  ;;  %v149_v10 = vld [vmem:[%s718_s4 + $0x20] sm:$0xff]  ;;  %v147_v16 = vld [vmem:[%s718_s4 + $0x10] sm:$0xff]  ;;  %v146_v17 = vld [vmem:[%s718_s4 + $0x8] sm:$0xff] }
   0xa   :  { %383 = vmatmul.msk.f32.vlgmr.msra.gmra.mxu2 %vm65_vm0, %v539_v2  ;;  %114 = vmatpush.msra.mxu1 %v94_v6  ;;  %v145_v18 = vld [vmem:[%s718_s4] sm:$0xff]  ;;  %v189_v19 = vld [vmem:[%s720_s6 + $0x38] sm:$0xff]  ;;  %v188_v21 = vld [vmem:[%s720_s6 + $0x30] sm:$0xff] }
   0xb   :  { %170 = vmatpush.msra.mxu3 %v151_v8  ;;  %v224_v20 = vld [vmem:[%s722_s8 + $0x38] sm:$0xff]  ;;  %v223_v22 = vld [vmem:[%s722_s8 + $0x30] sm:$0xff]  ;;  %v187_v23 = vld [vmem:[%s720_s6 + $0x28] sm:$0xff] }
   0xc   :  { %237 = vmatpush.msrb.mxu1 %v224_v20  ;;  %v222_v24 = vld [vmem:[%s722_s8 + $0x28] sm:$0xff]  ;;  %v186_v25 = vld [vmem:[%s720_s6 + $0x20] sm:$0xff]  ;;  %v185_v27 = vld [vmem:[%s720_s6 + $0x18] sm:$0xff] }
   0xd   :  { %171 = vmatpush.msra.mxu3 %v150_v9  ;;  %v221_v26 = vld [vmem:[%s722_s8 + $0x20] sm:$0xff]  ;;  %v220_v28 = vld [vmem:[%s722_s8 + $0x18] sm:$0xff]  ;;  %v184_v35 = vld [vmem:[%s720_s6 + $0x10] sm:$0xff] }
   0xe   :  { %238 = vmatpush.msrb.mxu1 %v223_v22  ;;  %v391_v30 = vld [vmem:[%s717_s3] ss:$0 sm:$0xff]  ;;  %v219_v36 = vld [vmem:[%s722_s8 + $0x10] sm:$0xff]  ;;  %v183_v37 = vld [vmem:[%s720_s6 + $0x8] sm:$0xff] }
   0xf   :  { %172 = vmatpush.msra.mxu3 %v149_v10  ;;  %v218_v38 = vld [vmem:[%s722_s8 + $0x8] sm:$0xff]  ;;  %v182_v39 = vld [vmem:[%s720_s6] sm:$0xff]  ;;  %v269_v47 = vld [vmem:[%s725_s11 + $0x78] sm:$0xff] }
  0x10   :  { %239 = vmatpush.msrb.mxu1 %v222_v24  ;;  %v217_v40 = vld [vmem:[%s722_s8] sm:$0xff]  ;;  %v292_v45 = vld [vmem:[%s726_s12 + $0x8] sm:$0xff]  ;;  %v268_v48 = vld [vmem:[%s725_s11 + $0x70] sm:$0xff]  ;;  %270 = vmatpush.msrb.mxu2 %v269_v47 }
  0x11   :  { %173 = vmatpush.msra.mxu3 %v148_v15  ;;  %v392_v41 = vld [vmem:[%s719_s5] ss:$0 sm:$0xff]  ;;  %314 = vmatpush.msrb.mxu0 %v269_v47  ;;  %v267_v49 = vld [vmem:[%s725_s11 + $0x68] sm:$0xff]  ;;  %v265_v51 = vld [vmem:[%s725_s11 + $0x58] sm:$0xff] }
  0x12   :  { %240 = vmatpush.msrb.mxu1 %v221_v26  ;;  %v291_v46 = vld [vmem:[%s726_s12] sm:$0xff]  ;;  %271 = vmatpush.msrb.mxu2 %v268_v48  ;;  %v264_v52 = vld [vmem:[%s725_s11 + $0x50] sm:$0xff]  ;;  %v263_v53 = vld [vmem:[%s725_s11 + $0x48] sm:$0xff] }
  0x13   :  { %174 = vmatpush.msra.mxu3 %v147_v16  ;;  %315 = vmatpush.msrb.mxu0 %v268_v48  ;;  %v266_v50 = vld [vmem:[%s725_s11 + $0x60] sm:$0xff]  ;;  %v261_v55 = vld [vmem:[%s725_s11 + $0x38] sm:$0xff]  ;;  %v260_v56 = vld [vmem:[%s725_s11 + $0x30] sm:$0xff] }
  0x14   :  { %241 = vmatpush.msrb.mxu1 %v220_v28  ;;  %272 = vmatpush.msrb.mxu2 %v267_v49  ;;  %v262_v54 = vld [vmem:[%s725_s11 + $0x40] sm:$0xff]  ;;  %v259_v60 = vld [vmem:[%s725_s11 + $0x28] sm:$0xff]  ;;  %v257_v62 = vld [vmem:[%s725_s11 + $0x18] sm:$0xff] }
  0x15   :  { %175 = vmatpush.msra.mxu3 %v146_v17  ;;  %316 = vmatpush.msrb.mxu0 %v267_v49  ;;  %v394_v57 = vld [vmem:[%s721_s7] ss:$0 sm:$0xff]  ;;  %v256_v63 = vld [vmem:[%s725_s11 + $0x10] sm:$0xff]  ;;  %v255_v0 = vld [vmem:[%s725_s11 + $0x8] sm:$0xff] }
  0x16   :  { %242 = vmatpush.msrb.mxu1 %v219_v36  ;;  %273 = vmatpush.msrb.mxu2 %v266_v50  ;;  %v258_v61 = vld [vmem:[%s725_s11 + $0x20] sm:$0xff]  ;;  %v338_v10 = vld [vmem:[%s727_s13 + $0x8] sm:$0xff] }
  0x17   :  { %176 = vmatpush.msra.mxu3 %v145_v18  ;;  %317 = vmatpush.msrb.mxu0 %v266_v50  ;;  %v254_v1 = vld [vmem:[%s725_s11] sm:$0xff] }
  0x18   :  { %243 = vmatpush.msrb.mxu1 %v218_v38  ;;  %274 = vmatpush.msrb.mxu2 %v265_v51 }
  0x19   :  { %205 = vmatpush.msrb.mxu3 %v189_v19  ;;  %318 = vmatpush.msrb.mxu0 %v265_v51 }
  0x1a   :  { %244 = vmatpush.msrb.mxu1 %v217_v40  ;;  %275 = vmatpush.msrb.mxu2 %v264_v52 }
  0x1b   :  { %206 = vmatpush.msrb.mxu3 %v188_v21  ;;  %319 = vmatpush.msrb.mxu0 %v264_v52 }
  0x1c   :  { %276 = vmatpush.msrb.mxu2 %v263_v53 }
  0x1d   :  { %207 = vmatpush.msrb.mxu3 %v187_v23  ;;  %320 = vmatpush.msrb.mxu0 %v263_v53 }
  0x1e   :  { %277 = vmatpush.msrb.mxu2 %v262_v54 }
  0x1f   :  { %208 = vmatpush.msrb.mxu3 %v186_v25  ;;  %321 = vmatpush.msrb.mxu0 %v262_v54 }
  0x20   :  { %278 = vmatpush.msrb.mxu2 %v261_v55 }
  0x21   :  { %209 = vmatpush.msrb.mxu3 %v185_v27  ;;  %322 = vmatpush.msrb.mxu0 %v261_v55 }
  0x22   :  { %279 = vmatpush.msrb.mxu2 %v260_v56 }
  0x23   :  { %210 = vmatpush.msrb.mxu3 %v184_v35  ;;  %323 = vmatpush.msrb.mxu0 %v260_v56 }
  0x24   :  { %280 = vmatpush.msrb.mxu2 %v259_v60 }
  0x25   :  { %211 = vmatpush.msrb.mxu3 %v183_v37  ;;  %324 = vmatpush.msrb.mxu0 %v259_v60 }
  0x26   :  { %281 = vmatpush.msrb.mxu2 %v258_v61 }
  0x27   :  { %212 = vmatpush.msrb.mxu3 %v182_v39  ;;  %325 = vmatpush.msrb.mxu0 %v258_v61 }
  0x28   :  { %282 = vmatpush.msrb.mxu2 %v257_v62 }
  0x29   :  { %326 = vmatpush.msrb.mxu0 %v257_v62 }
  0x2a   :  { %283 = vmatpush.msrb.mxu2 %v256_v63 }
  0x2b   :  { %327 = vmatpush.msrb.mxu0 %v256_v63 }
  0x2c   :  { %284 = vmatpush.msrb.mxu2 %v255_v0 }
  0x2d   :  { %328 = vmatpush.msrb.mxu0 %v255_v0 }
  0x2e   :  { %285 = vmatpush.msrb.mxu2 %v254_v1 }
  0x2f   :  { %329 = vmatpush.msrb.mxu0 %v254_v1 }
  0x86   :  { %v86_v11 = vpop.f32.mrf.mxu0 }
  0x87   :  { %v89_v12 = vmax.f32 %v86_v11, 1e-08  ;;  %v337_v11 = vld [vmem:[%s727_s13] sm:$0xff] }
  0x89   :  { %395 = vrcp.f32 %v89_v12 }
  0x8d   :  { %v136_v29 = vpop.f32.mrf.mxu2 }
  0x8f   :  { %v396_v13 = vpop.eup %395 }
  0x90   :  { %v91_v14 = vmul.f32 %v396_v13, %v539_v2  ;;  %v393_v13 = vld [vmem:[%s723_s9] ss:$0 sm:$0xff] }
  0x92   :  { %382 = vmatmul.msk.f32.vlgmr.msra.gmra.mxu1 %vm65_vm0, %v91_v14 }
  0x93   :  { %307 = vmatpush.msra.mxu1 %v292_v45 }
  0x95   :  { %308 = vmatpush.msra.mxu1 %v291_v46 }
 0x10f   :  { %v116_v31 = vpop.f32.mrf.mxu1 }
 0x110   :  { %v137_v32 = vadd.f32 %v136_v29, %v116_v31 }
 0x112   :  { %v143_v33 = vadd.f32 %v391_v30, %v137_v32 }
 0x114   :  { %v144_v34 = vmax.f32 %v143_v33, 0.0 }
 0x116   :  { %384 = vmatmul.msk.f32.vlgmr.msra.gmra.mxu3 %vm157_vm1, %v144_v34 }
 0x199   :  { %v178_v42 = vpop.f32.mrf.mxu3 }
 0x19a   :  { %v179_v43 = vadd.f32 %v392_v41, %v178_v42 }
 0x19c   :  { %v181_v44 = vmax.f32 %v179_v43, 0.0 }
 0x19e   :  { %385 = vmatmul.msk.f32.vlgmr.msrb.gmra.mxu3 %vm157_vm1, %v181_v44  ;;  %386 = vmatmul.msk.f32.vlgmr.msrb.gmra.mxu1 %vm157_vm1, %v181_v44 }
 0x19f   :  { %356 = vmatpush.msrb.mxu1 %v338_v10 }
 0x1a1   :  { %357 = vmatpush.msrb.mxu1 %v337_v11 }
 0x1a6   :  { %387 = vmatmul.msk.f32.vlgmr.msra.gmra.mxu1 %vm65_vm0, %v539_v2 }
 0x21b   :  { %v246_v4 = vpop.f32.mrf.mxu1 }
 0x21c   :  { %v247_v17 = vadd.f32 %v393_v13, %v246_v4 }
 0x221   :  { %v214_v58 = vpop.f32.mrf.mxu3 }
 0x222   :  { %v215_v59 = vadd.f32 %v394_v57, %v214_v58 }
 0x223   :  { %v310_v7 = vpop.f32.mrf.mxu1 }
 0x224   :  { %249 = vmax.xlane.f32.xlu0 %v215_v59 }
 0x297   :  { %v250_v3 = vpop.xlane.xlu0 %249 }
 0x298   :  { %v251_v5 = vsub.f32 %v215_v59, %v250_v3 }
 0x29a   :  { %v252_v6 = vmul.f32 1.442695, %v251_v5 }
 0x29c   :  { %397 = vpow2.f32 %v252_v6 }
 0x2a2   :  { %v398_v8 = vpop.eup %397 }
 0x2a3   :  { %v313_v9 = vmul.f32 %v398_v8, %v310_v7  ;;  %286 = vmatmul.f32.vlgmr.msrb.gmra.mxu2 %v398_v8 }
 0x2a5   :  { %330 = vmatmul.f32.vlgmr.msrb.gmra.mxu0 %v313_v9 }
 0x322   :  { %v331_v15 = vpop.f32.mrf.mxu0 }
 0x326   :  { %v287_v12 = vpop.f32.mrf.mxu2 }
 0x327   :  { %399 = vrcp.f32 %v287_v12 }
 0x32d   :  { %v400_v14 = vpop.eup %399 }
 0x32e   :  { %v334_v16 = vmul.f32 %v400_v14, %v331_v15 }
 0x330   :  { %v335_v18 = vsub.f32 %v334_v16, %v539_v2 }
 0x332   :  { %v336_v19 = vmul.f32 %v335_v18, %v247_v17 }
 0x334   :  { %388 = vmatmul.msk.f32.vlgmr.msrb.gmra.mxu1 %vm65_vm0, %v336_v19 }
 0x3b1   :  { %v359_v20 = vpop.f32.mrf.mxu1 }
 0x3b2   :  { %v362_v21 = vsub.f32 %v336_v19, %v359_v20 }
 0x3b4   :  { %363 = vst.msk [vmem:[#allocation5] sm:$0xff] %vm65_vm0, %v362_v21 }
 0x3b5   :  { %374 = dma.vmem_to_hbm [thread:$0]  %s370_s30, 128, %s372_s1, [#allocation4]  }
 0x3b6   :  { %451 = dma.done.wait [#allocation4], 128  }
 0x3b7   :  { %452 = vsyncadd [#allocation4], 4294967168 }
 0x3b8   :  { %379 = vsyncpa [#allocation3], 1 }
 0x3b9   :  { %380 = vsyncpa [#allocation4], 1 }

</bundles_post_ra>
